<compile_context>
chip_gen: v7x
topology: tpu7x:2x2x1
jax: 0.10.0
libtpu: 0.0.40
codegen_flags: <defaults>
</compile_context>

<pallas_src>
import functools

import jax
import jax.numpy as jnp
from jax import lax
from jax.experimental import pallas as pl
from jax.experimental.pallas import tpu as pltpu


_PRED_TILE_BYTES = 8 * 1024 * 1024    # per-buffer pred tile budget (x2 double-buffered)
_VMEM_LIMIT_BYTES = 32 * 1024 * 1024  # safe on v5e/v6e (128 MiB) and v7x (64 MiB)
_ROW_ALIGN = 32                       # covers f32 (8), bf16 (16) and int8 (32) sublane tiles


def _cdiv(a, b):
    return -(-a // b)


def _round_up(a, m):
    return _cdiv(a, m) * m


def _nll_partial_kernel(pred_ref, tgt_ref, out_ref, *, n_sub):
    """Writes sum_r pred[r, flat_target[r]] for this tile into out_ref."""
    pred = pred_ref[...]                        # (tb, Cp), native dtype
    tgt = tgt_ref[...].astype(jnp.int32)        # (tb, n_sub) flat ids; -1 = padding

    tb, cp = pred.shape
    col = lax.broadcasted_iota(jnp.int32, (tb, cp), 1)   # hoisted, one iota per tile

    # One-hot over the packed lane axis: column c hits iff it equals one of the
    # n_sub flat targets of its packed row (sub-row j's target lies in
    # [j*C, (j+1)*C), so at most one can match; -1 sentinels never match).
    hit = col == tgt[:, 0:1]
    for j in range(1, n_sub):                   # static unroll, n_sub <= 8
        hit = jnp.logical_or(hit, col == tgt[:, j:j + 1])

    # Select in pred's native dtype; accumulate in f32 only inside the reduce.
    picked = jnp.where(hit, pred, 0)
    total = jnp.sum(picked.astype(jnp.float32))

    # Lane-dense (unmasked) store of this tile's partial sum.
    out_ref[...] = jnp.full((1, 1, 128), total, dtype=jnp.float32)


def nll_loss(pred, target, trans_feat=None):
    """Pallas equivalent of get_loss.forward(pred, target, trans_feat)."""
    del trans_feat  # unused, exactly as in the PyTorch module
    B, C = pred.shape

    # --- lane packing: fold k rows into the 128-lane axis (Cp = C*k <= 128) ---
    k = 1
    for cand in (8, 4, 2):
        if C * cand <= 128 and B % cand == 0:
            k = cand
            break
    Bp, Cp = B // k, C * k

    # pred keeps its native dtype and contiguous HBM layout (reshape is free).
    pred_p = pred.reshape(Bp, Cp)

    # --- batch tiling (per-generation-safe VMEM budget, grid >= 2 when possible) ---
    bytes_per_row = Cp * pred_p.dtype.itemsize
    rows_budget = max(_ROW_ALIGN, _PRED_TILE_BYTES // bytes_per_row)
    if Bp <= rows_budget:
        if Bp >= 2 * _ROW_ALIGN:
            # Split so ("parallel",) can shard tiles across both v7x TensorCores.
            tb = _round_up(_cdiv(Bp, 2), _ROW_ALIGN)
        else:
            tb = Bp                    # tiny batch: single full-array block
    else:
        tb = (rows_budget // _ROW_ALIGN) * _ROW_ALIGN
    grid = _cdiv(Bp, tb)

    # --- flat targets: lane-folded, narrow dtype, sentinel-padded to grid*tb ---
    if Cp <= 128:
        tgt_dtype = jnp.int8           # flat ids in [0, 128); -1 = padding
    elif Cp <= 2 ** 15:
        tgt_dtype = jnp.int16
    else:
        tgt_dtype = jnp.int32
    flat_tgt = (target.astype(jnp.int32).reshape(Bp, k)
                + (jnp.arange(k, dtype=jnp.int32) * C)[None, :])
    pad_rows = grid * tb - Bp
    if pad_rows:
        flat_tgt = jnp.concatenate(
            [flat_tgt, jnp.full((pad_rows, k), -1, jnp.int32)], axis=0)
    flat_tgt = flat_tgt.astype(tgt_dtype)

    kernel = functools.partial(_nll_partial_kernel, n_sub=k)

    partials = pl.pallas_call(
        kernel,
        out_shape=jax.ShapeDtypeStruct((grid, 1, 128), jnp.float32),
        grid_spec=pltpu.PrefetchScalarGridSpec(
            num_scalar_prefetch=0,
            grid=(grid,),
            in_specs=[
                pl.BlockSpec((tb, Cp), lambda i: (i, 0)),
                pl.BlockSpec((tb, k), lambda i: (i, 0)),
            ],
            out_specs=pl.BlockSpec((1, 1, 128), lambda i: (i, 0, 0)),
        ),
        compiler_params=pltpu.CompilerParams(
            dimension_semantics=("parallel",),   # shards tiles across TCs on v7x
            vmem_limit_bytes=_VMEM_LIMIT_BYTES,
        ),
    )(pred_p, flat_tgt)

    # Tiny epilogue: combine per-tile partials, scale by compile-time -1/B.
    return jnp.sum(partials[:, 0, 0]) * jnp.float32(-1.0 / B)


if __name__ == "__main__":
    key = jax.random.PRNGKey(0)

    def _check(B, C, dtype, tol):
        k1, k2, k3 = jax.random.split(jax.random.fold_in(key, B * 131 + C), 3)
        logits = jax.random.normal(k1, (B, C), dtype=jnp.float32)
        pred = jax.nn.log_softmax(logits, axis=-1).astype(dtype)   # log-probs
        target = jax.random.randint(k2, (B,), 0, C, dtype=jnp.int32)
        trans_feat = jax.random.normal(k3, (B, 3, 3), dtype=jnp.float32)  # unused
        loss = nll_loss(pred, target, trans_feat)
        jax.block_until_ready(loss)
        ref = -jnp.mean(pred.astype(jnp.float32)[jnp.arange(B), target])
        assert jnp.allclose(loss, ref, atol=tol, rtol=tol), (B, C, str(dtype), loss, ref)

    # PointNet++-scale case (ModelNet40 head): single tile, k=2 lane packing.
    _check(B=8, C=40, dtype=jnp.float32, tol=1e-5)
    # Multi-tile + ragged last tile (grid=2, sentinel-padded targets), f32.
    _check(B=1000, C=40, dtype=jnp.float32, tol=2e-5)
    # bf16 pred, fully dense Cp=128 packing, two exact tiles.
    _check(B=512, C=16, dtype=jnp.bfloat16, tol=2e-5)

    print("KERNEL_OK")
</pallas_src>

<mosaic_0001>
module attributes {stable_mosaic.version = 11 : i64} {
  func.func @_nll_partial_kernel(%arg0: i32, %arg1: memref<4x80xf32, #tpu.memory_space<vmem>>, %arg2: memref<4x2xi8, #tpu.memory_space<vmem>>, %arg3: memref<1x1x128xf32, #tpu.memory_space<vmem>>) attributes {dimension_semantics = [#tpu.dimension_semantics<parallel>], iteration_bounds = array<i64: 1>, scalar_prefetch = 0 : i64, scratch_operands = 0 : i64, tpu.core_type = #tpu.core_type<tc>, window_params = [{transform_indices = @transform_0, window_bounds = array<i64: 4, 80>}, {transform_indices = @transform_1, window_bounds = array<i64: 4, 2>}, {transform_indices = @transform_2, window_bounds = array<i64: 1, 1, 128>}]} {
    %c0 = arith.constant 0 : index
    %c0_0 = arith.constant 0 : index
    %0 = vector.load %arg1[%c0, %c0_0] : memref<4x80xf32, #tpu.memory_space<vmem>>, vector<4x80xf32>
    %c0_1 = arith.constant 0 : index
    %c0_2 = arith.constant 0 : index
    %1 = vector.load %arg2[%c0_1, %c0_2] : memref<4x2xi8, #tpu.memory_space<vmem>>, vector<4x2xi8>
    %2 = arith.extsi %1 : vector<4x2xi8> to vector<4x2xi32>
    %3 = tpu.iota {dimensions = array<i32: 1>} : vector<4x80xi32>
    %4 = vector.extract_strided_slice %2 {offsets = [0, 0], sizes = [4, 1], strides = [1, 1]} : vector<4x2xi32> to vector<4x1xi32>
    %5 = vector.broadcast %4 : vector<4x1xi32> to vector<4x80xi32>
    %6 = arith.cmpi eq, %3, %5 : vector<4x80xi32>
    %7 = vector.extract_strided_slice %2 {offsets = [0, 1], sizes = [4, 1], strides = [1, 1]} : vector<4x2xi32> to vector<4x1xi32>
    %8 = vector.broadcast %7 : vector<4x1xi32> to vector<4x80xi32>
    %9 = arith.cmpi eq, %3, %8 : vector<4x80xi32>
    %10 = arith.ori %6, %9 : vector<4x80xi1>
    %c0_i32 = arith.constant 0 : i32
    %11 = arith.sitofp %c0_i32 : i32 to f32
    %12 = vector.broadcast %11 : f32 to vector<4x80xf32>
    %13 = arith.select %10, %0, %12 : vector<4x80xi1>, vector<4x80xf32>
    %14 = vector.shape_cast %13 : vector<4x80xf32> to vector<1x4x80xf32>
    %cst = arith.constant dense<0.000000e+00> : vector<1xf32>
    %15 = vector.multi_reduction <add>, %14, %cst [1, 2] : vector<1x4x80xf32> to vector<1xf32>
    %16 = vector.shape_cast %15 : vector<1xf32> to vector<1x1x1xf32>
    %17 = vector.extract %16[0, 0, 0] : f32 from vector<1x1x1xf32>
    %18 = vector.broadcast %17 : f32 to vector<1x1x128xf32>
    %c0_3 = arith.constant 0 : index
    %c0_4 = arith.constant 0 : index
    %c0_5 = arith.constant 0 : index
    %19 = vector.load %arg3[%c0_3, %c0_4, %c0_5] : memref<1x1x128xf32, #tpu.memory_space<vmem>>, vector<1x1x128xf32>
    tpu.vector_store %arg3[%c0_3, %c0_4, %c0_5], %18 {strides = array<i32>} : memref<1x1x128xf32, #tpu.memory_space<vmem>>, vector<1x1x128xf32>,
    return
  }
  func.func @transform_0(%arg0: i32) -> (i32, i32) {
    %c0_i32 = arith.constant 0 : i32
    %c0_i32_0 = arith.constant 0 : i32
    return %arg0, %c0_i32 : i32, i32
  }
  func.func @transform_1(%arg0: i32) -> (i32, i32) {
    %c0_i32 = arith.constant 0 : i32
    %c0_i32_0 = arith.constant 0 : i32
    return %arg0, %c0_i32 : i32, i32
  }
  func.func @transform_2(%arg0: i32) -> (i32, i32, i32) {
    %c0_i32 = arith.constant 0 : i32
    %c0_i32_0 = arith.constant 0 : i32
    %c0_i32_1 = arith.constant 0 : i32
    return %arg0, %c0_i32, %c0_i32_0 : i32, i32, i32
  }
}

</mosaic_0001>

<bundles_post_ra>
// kernel: tpu_custom_call.1
= control target key start
LH: loop header
LB: loop body
LE: loop exit
PB: predicated region body
PF: predicated region fallthrough
CT: control target
= control target key end

     0   :  { %7 = vsyncpa [#allocation3], 0  ;;  %s185_s0 = inlined_call_operand.hbm [shape: f32[4,80], index: 0, kind: input, shape index: {}]   ;;  %s186_s1 = inlined_call_operand.vmem [shape: s8[4,2], index: 1, kind: input, shape index: {}]   ;;  %s187_s2 = inlined_call_operand.hbm [shape: f32[1,1,128], index: 2, kind: output, shape index: {}]  }
   0x1   :  { %8 = vsyncpa [#allocation4], 0  ;;  %s138_s9 = smov [#allocation2]   ;;  %s90_s13 = scalar_lea.hbm %s185_s0, 64 }
   0x2   :  { %s15_s10 = sshll.u32 %s138_s9, 4  ;;  %p91_p0 = scmp.ne.s32.totalorder %s185_s0, %s90_s13  ;;  %s16_s10 = int_to_ptr.vmem [resolvable:$true] %s15_s10 }
   0x3   :  { %p94_p1 = scmp.lt.u32.totalorder %s90_s13, %s185_s0 }
   0x5   :  { %p96_p2 = pnand %p94_p1, %p91_p0 }
   0x7   :  { %99 = shalt.err (!%p96_p2)
}
   0x8   :  { %s100_s18 = scalar_lea.vmem %s16_s10, 64  ;;  %p105_p4 = scmp.lt.s32.totalorder %s16_s10, %s16_s10 }
   0x9   :  { %p101_p3 = scmp.ne.s32.totalorder %s16_s10, %s100_s18  ;;  %p106_p5 = scmp.lt.s32.totalorder %s100_s18, %s100_s18 }
   0xb   :  { %p107_p6 = por %p106_p5, %p105_p4 }
   0xd   :  { %p108_p7 = pnand %p107_p6, %p101_p3 }
   0xf   :  { %111 = shalt.err (!%p108_p7)
}
  0x10   :  { %18 = dma.hbm_to_vmem [thread:$0]  %s185_s0, 64, %s16_s10, [#allocation3]  }
  0x11   :  { %134 = dma.done.wait [#allocation3], 64  }
  0x12   :  { %135 = vsyncadd [#allocation3], 4294967232  ;;  %v139_v0 = vmov 0   ;;  %v25_v1 = vld [vmem:[%s186_s1] sm:$0x1]  ;;  %v140_v3 = vmov 1   ;;  %v27_v4 = vlaneseq }
  0x13   :  { %88 = vset.pattern.permute.xlu0 %v139_v0  ;;  %v26_v2 = vunpack.c.0.s8 %v25_v1  ;;  %v141_v5 = vmov 839922192   ;;  %v24_v15 = vld [vmem:[#allocation2] sm:$0xf]  ;;  %vm53_vm2 = vcmask 650240   ;;  %s142_s0 = smov [#allocation5]  }
  0x14   :  { %v33_v6 = vunpack.c.l.s4 %v141_v5  ;;  %v36_v8 = vshrl.u32 %v27_v4, 7  ;;  %v28_v11 = vand.u32 127, %v27_v4  ;;  %s72_s1 = sshll.u32 %s142_s0, 4  ;;  %s73_s1 = int_to_ptr.vmem [resolvable:$true] %s72_s1 }
  0x15   :  { %30 = vperm.xlu0 %88, %v26_v2   ;;  %s112_s24 = scalar_lea.vmem %s73_s1, 16  ;;  %s116_s25 = scalar_lea.vmem %s73_s1, 32 }
  0x16   :  { %v34_v7 = vunpack.c.0.s8 %v33_v6  ;;  %p113_p8 = scmp.ne.s32.totalorder %s73_s1, %s112_s24  ;;  %p117_p9 = scmp.lt.s32.totalorder %s73_s1, %s73_s1 }
  0x17   :  { %p118_p10 = scmp.lt.s32.totalorder %s116_s25, %s112_s24 }
  0x18   :  { %v37_v9 = vsub.s32 %v34_v7, %v36_v8 }
  0x19   :  { %89 = vset.pattern.permute.xlu0 %v140_v3  ;;  %p119_p11 = por %p118_p10, %p117_p9 }
  0x1a   :  { %41 = vperm.xlu0 %89, %v26_v2  }
  0x1b   :  { %p120_p12 = pnand %p119_p11, %p113_p8 }
  0x94   :  { %v31_v10 = vpop.permute.xlu0 %30 }
  0x95   :  { %v38_v12 = vrot.slane %v31_v10, %v37_v9 }
  0x97   :  { %vm39_vm0 = vcmp.eq.s32.totalorder %v28_v11, %v38_v12 }
  0x99   :  { %v42_v13 = vpop.permute.xlu0 %41 }
  0x9a   :  { %v49_v14 = vrot.slane %v42_v13, %v37_v9 }
  0x9c   :  { %vm50_vm1 = vcmp.eq.s32.totalorder %v28_v11, %v49_v14 }
  0x9d   :  { %vm51_vm3 = vmor %vm39_vm0, %vm50_vm1 }
  0x9e   :  { %v52_v16 = vsel %vm51_vm3, %v24_v15, 0.0 }
  0x9f   :  { %v54_v17 = vsel %vm53_vm2, %v52_v16, 0.0 }
  0xa0   :  { %55 = vadd.xlane.f32.xlu1 %v54_v17 }
 0x12d   :  { %v56_v18 = vpop.xlane.xlu1 %55 }
 0x12e   :  { %v57_v19 = vrot.slane %v56_v18, 4 }
 0x130   :  { %v58_v20 = vadd.f32 %v57_v19, %v56_v18 }
 0x132   :  { %v59_v21 = vrot.slane %v58_v20, 2 }
 0x134   :  { %v60_v22 = vadd.f32 %v59_v21, %v58_v20 }
 0x136   :  { %v61_v23 = vrot.slane %v60_v22, 1 }
 0x138   :  { %v62_v24 = vadd.f32 %v61_v23, %v60_v22 }
 0x13a   :  { %81 = vpush %v62_v24 }
 0x16b   :  { %s82_s23 = spop %81 }
 0x16c   :  { %v64_v25 = vstv %s82_s23 }
 0x16d   :  { %65 = vst [vmem:[#allocation5] sm:$0x1] %v64_v25 }
 0x16e   :  { %123 = shalt.err (!%p120_p12)
}
 0x16f   :  { %s124_s28 = scalar_lea.hbm %s187_s2, 16 }
 0x170   :  { %p125_p13 = scmp.ne.s32.totalorder %s187_s2, %s124_s28  ;;  %p128_p0 = scmp.lt.u32.totalorder %s124_s28, %s187_s2 }
 0x172   :  { %p130_p1 = pnand %p128_p0, %p125_p13 }
 0x174   :  { %133 = shalt.err (!%p130_p1)
}
 0x175   :  { %75 = dma.vmem_to_hbm [thread:$0]  %s73_s1, 16, %s187_s2, [#allocation4]  }
 0x176   :  { %136 = dma.done.wait [#allocation4], 16  }
 0x177   :  { %137 = vsyncadd [#allocation4], 4294967280 }
 0x178   :  { %79 = vsyncpa [#allocation3], 1 }
 0x179   :  { %80 = vsyncpa [#allocation4], 1 }

</bundles_post_ra>
